<compile_context>
chip_gen: v5e
topology: v5e:2x2
jax: 0.10.0
libtpu: 0.0.40
codegen_flags: <defaults>
</compile_context>

<pallas_src>
import jax
import jax.numpy as jnp
from jax.experimental import pallas as pl
from jax.experimental.pallas import tpu as pltpu

IGNORE_INDEX = -1


def _ce2d_kernel(x_ref, t_ref, sum_ref, cnt_ref):
    # x_ref:   (1, C, TP) logits (any float dtype; cast to f32 in-kernel)
    # t_ref:   (1, 1, TP) int32 targets
    # sum_ref: (1, 1, TP) f32 running sum of -log p[target] per lane
    # cnt_ref: (1, 1, TP) f32 running count of valid (non-ignored) pixels
    @pl.when(pl.program_id(1) == 0)
    def _():
        sum_ref[...] = jnp.zeros_like(sum_ref)
        cnt_ref[...] = jnp.zeros_like(cnt_ref)

    x = x_ref[...].astype(jnp.float32)            # (1, C, TP); bf16 input OK
    t = t_ref[...]                                # (1, 1, TP)

    # Numerically stable log-sum-exp over the class (sublane) axis.
    m = jnp.max(x, axis=1, keepdims=True)                              # (1,1,TP)
    lse = jnp.log(jnp.sum(jnp.exp(x - m), axis=1, keepdims=True))      # (1,1,TP)

    # Target-class logit via one-hot select (no full logp tensor materialized).
    cls = jax.lax.broadcasted_iota(jnp.int32, x.shape, 1)              # (1,C,TP)
    x_t = jnp.sum(jnp.where(cls == t, x, 0.0), axis=1, keepdims=True)  # (1,1,TP)

    valid = t != IGNORE_INDEX
    # -log p[target] = (m + lse) - x_t; ignored / padded pixels contribute 0.
    sum_ref[...] += jnp.where(valid, (m + lse) - x_t, 0.0)
    cnt_ref[...] += valid.astype(jnp.float32)


def cross_entropy_loss_2d(logits_nchw, targets_nhw, *, tile_p=8192):
    """Matches nn.NLLLoss2d(F.log_softmax(x, dim=1), t) with default args."""
    N, C, H, W = logits_nchw.shape
    HW = H * W

    # Free reshapes only -- no NCHW->NHWC transpose, no extra HBM traffic.
    x = logits_nchw.reshape(N, C, HW)
    t = targets_nhw.reshape(N, 1, HW).astype(jnp.int32)

    # Lane-dense pixel tile: multiple of 128, capped so the double-buffered
    # logits block stays <= ~8 MiB (fits scoped VMEM on v5e/v6e/v7x alike).
    hw_aligned = ((HW + 127) // 128) * 128
    budget_tile = max(128, ((8 << 20) // (C * 4 * 2)) // 128 * 128)
    tile_p = max(128, min((tile_p // 128) * 128, hw_aligned, budget_tile))

    HWp = ((HW + tile_p - 1) // tile_p) * tile_p
    if HWp != HW:
        # Padded pixels carry ignore_index -> contribute nothing to sum/count.
        x = jnp.pad(x, ((0, 0), (0, 0), (0, HWp - HW)))
        t = jnp.pad(t, ((0, 0), (0, 0), (0, HWp - HW)),
                    constant_values=IGNORE_INDEX)

    grid = (N, HWp // tile_p)
    sum_part, cnt_part = pl.pallas_call(
        _ce2d_kernel,
        out_shape=(
            jax.ShapeDtypeStruct((N, 1, tile_p), jnp.float32),
            jax.ShapeDtypeStruct((N, 1, tile_p), jnp.float32),
        ),
        grid_spec=pltpu.PrefetchScalarGridSpec(
            num_scalar_prefetch=0,
            grid=grid,
            in_specs=[
                pl.BlockSpec((1, C, tile_p), lambda n, i: (n, 0, i)),
                pl.BlockSpec((1, 1, tile_p), lambda n, i: (n, 0, i)),
            ],
            out_specs=[
                pl.BlockSpec((1, 1, tile_p), lambda n, i: (n, 0, 0)),
                pl.BlockSpec((1, 1, tile_p), lambda n, i: (n, 0, 0)),
            ],
        ),
        # Batch axis is independent -> "parallel" (shards across v7x's two
        # TensorCores); pixel-tile axis is the running reduction -> "arbitrary".
        compiler_params=pltpu.CompilerParams(
            dimension_semantics=("parallel", "arbitrary")),
    )(x, t)

    # Tiny final reduction + mean over valid pixels (size_average=True).
    # NOTE: if every target is ignore_index the count is 0 -> NaN, matching
    # PyTorch's behavior for an all-ignored batch.
    return jnp.sum(sum_part) / jnp.sum(cnt_part)


def _reference(logits_nchw, targets_nhw):
    logp = jax.nn.log_softmax(logits_nchw.astype(jnp.float32), axis=1)
    t = targets_nhw
    valid = t != IGNORE_INDEX
    t_safe = jnp.where(valid, t, 0)
    picked = jnp.take_along_axis(logp, t_safe[:, None, :, :], axis=1)[:, 0]
    loss_sum = jnp.sum(jnp.where(valid, -picked, 0.0))
    return loss_sum / jnp.sum(valid.astype(jnp.float32))


if __name__ == "__main__":
    key = jax.random.PRNGKey(0)
    k1, k2 = jax.random.split(key)

    N, C, H, W = 2, 4, 16, 16
    inputs = jax.random.normal(k1, (N, C, H, W), dtype=jnp.float32)
    # Targets in [-1, C): -1 exercises ignore_index.
    targets = jax.random.randint(k2, (N, H, W), minval=-1, maxval=C,
                                 dtype=jnp.int32)

    loss = jax.block_until_ready(cross_entropy_loss_2d(inputs, targets))
    ref = jax.block_until_ready(_reference(inputs, targets))
    assert jnp.allclose(loss, ref, rtol=1e-5, atol=1e-5), (loss, ref)
    print("KERNEL_OK")
</pallas_src>

<mosaic_0001>
module attributes {stable_mosaic.version = 11 : i64} {
  func.func @_ce2d_kernel(%arg0: i32, %arg1: i32, %arg2: memref<1x4x256xf32, #tpu.memory_space<vmem>>, %arg3: memref<1x1x256xi32, #tpu.memory_space<vmem>>, %arg4: memref<1x1x256xf32, #tpu.memory_space<vmem>>, %arg5: memref<1x1x256xf32, #tpu.memory_space<vmem>>) attributes {dimension_semantics = [#tpu.dimension_semantics<parallel>, #tpu.dimension_semantics<arbitrary>], iteration_bounds = array<i64: 2, 1>, scalar_prefetch = 0 : i64, scratch_operands = 0 : i64, tpu.core_type = #tpu.core_type<tc>, window_params = [{transform_indices = @transform_0, window_bounds = array<i64: 1, 4, 256>}, {transform_indices = @transform_1, window_bounds = array<i64: 1, 1, 256>}, {transform_indices = @transform_2, window_bounds = array<i64: 1, 1, 256>}, {transform_indices = @transform_3, window_bounds = array<i64: 1, 1, 256>}]} {
    %c0_i32 = arith.constant 0 : i32
    %0 = arith.cmpi eq, %arg1, %c0_i32 : i32
    %1 = arith.extui %0 : i1 to i32
    %c0_i32_0 = arith.constant 0 : i32
    %2 = arith.cmpi ne, %1, %c0_i32_0 : i32
    scf.if %2 {
      %cst_22 = arith.constant 0.000000e+00 : f32
      %34 = vector.broadcast %cst_22 : f32 to vector<1x1x256xf32>
      %c0_23 = arith.constant 0 : index
      %c0_24 = arith.constant 0 : index
      %c0_25 = arith.constant 0 : index
      %35 = vector.load %arg4[%c0_23, %c0_24, %c0_25] : memref<1x1x256xf32, #tpu.memory_space<vmem>>, vector<1x1x256xf32>
      tpu.vector_store %arg4[%c0_23, %c0_24, %c0_25], %34 {strides = array<i32>} : memref<1x1x256xf32, #tpu.memory_space<vmem>>, vector<1x1x256xf32>,
      %cst_26 = arith.constant 0.000000e+00 : f32
      %36 = vector.broadcast %cst_26 : f32 to vector<1x1x256xf32>
      %c0_27 = arith.constant 0 : index
      %c0_28 = arith.constant 0 : index
      %c0_29 = arith.constant 0 : index
      %37 = vector.load %arg5[%c0_27, %c0_28, %c0_29] : memref<1x1x256xf32, #tpu.memory_space<vmem>>, vector<1x1x256xf32>
      tpu.vector_store %arg5[%c0_27, %c0_28, %c0_29], %36 {strides = array<i32>} : memref<1x1x256xf32, #tpu.memory_space<vmem>>, vector<1x1x256xf32>,
    } else {
    }
    %c0 = arith.constant 0 : index
    %c0_1 = arith.constant 0 : index
    %c0_2 = arith.constant 0 : index
    %3 = vector.load %arg2[%c0, %c0_1, %c0_2] : memref<1x4x256xf32, #tpu.memory_space<vmem>>, vector<1x4x256xf32>
    %c0_3 = arith.constant 0 : index
    %c0_4 = arith.constant 0 : index
    %c0_5 = arith.constant 0 : index
    %4 = vector.load %arg3[%c0_3, %c0_4, %c0_5] : memref<1x1x256xi32, #tpu.memory_space<vmem>>, vector<1x1x256xi32>
    %cst = arith.constant dense<0xFF800000> : vector<1x256xf32>
    %5 = vector.multi_reduction <maximumf>, %3, %cst [1] : vector<1x4x256xf32> to vector<1x256xf32>
    %6 = vector.shape_cast %5 : vector<1x256xf32> to vector<1x1x256xf32>
    %7 = vector.broadcast %6 : vector<1x1x256xf32> to vector<1x4x256xf32>
    %8 = arith.subf %3, %7 : vector<1x4x256xf32>
    %9 = math.exp %8 : vector<1x4x256xf32>
    %cst_6 = arith.constant dense<0.000000e+00> : vector<1x256xf32>
    %10 = vector.multi_reduction <add>, %9, %cst_6 [1] : vector<1x4x256xf32> to vector<1x256xf32>
    %11 = vector.shape_cast %10 : vector<1x256xf32> to vector<1x1x256xf32>
    %12 = math.log %11 : vector<1x1x256xf32>
    %13 = tpu.iota {dimensions = array<i32: 1>} : vector<1x4x256xi32>
    %14 = vector.broadcast %4 : vector<1x1x256xi32> to vector<1x4x256xi32>
    %15 = arith.cmpi eq, %13, %14 : vector<1x4x256xi32>
    %cst_7 = arith.constant 0.000000e+00 : f32
    %16 = vector.broadcast %cst_7 : f32 to vector<1x4x256xf32>
    %17 = arith.select %15, %3, %16 : vector<1x4x256xi1>, vector<1x4x256xf32>
    %cst_8 = arith.constant dense<0.000000e+00> : vector<1x256xf32>
    %18 = vector.multi_reduction <add>, %17, %cst_8 [1] : vector<1x4x256xf32> to vector<1x256xf32>
    %19 = vector.shape_cast %18 : vector<1x256xf32> to vector<1x1x256xf32>
    %c-1_i32 = arith.constant -1 : i32
    %20 = vector.broadcast %c-1_i32 : i32 to vector<1x1x256xi32>
    %21 = arith.cmpi ne, %4, %20 : vector<1x1x256xi32>
    %c0_9 = arith.constant 0 : index
    %c0_10 = arith.constant 0 : index
    %c0_11 = arith.constant 0 : index
    %22 = vector.load %arg4[%c0_9, %c0_10, %c0_11] : memref<1x1x256xf32, #tpu.memory_space<vmem>>, vector<1x1x256xf32>
    %23 = arith.addf %6, %12 : vector<1x1x256xf32>
    %24 = arith.subf %23, %19 : vector<1x1x256xf32>
    %cst_12 = arith.constant 0.000000e+00 : f32
    %25 = vector.broadcast %cst_12 : f32 to vector<1x1x256xf32>
    %26 = arith.select %21, %24, %25 : vector<1x1x256xi1>, vector<1x1x256xf32>
    %27 = arith.addf %22, %26 : vector<1x1x256xf32>
    %c0_13 = arith.constant 0 : index
    %c0_14 = arith.constant 0 : index
    %c0_15 = arith.constant 0 : index
    %28 = vector.load %arg4[%c0_13, %c0_14, %c0_15] : memref<1x1x256xf32, #tpu.memory_space<vmem>>, vector<1x1x256xf32>
    tpu.vector_store %arg4[%c0_13, %c0_14, %c0_15], %27 {strides = array<i32>} : memref<1x1x256xf32, #tpu.memory_space<vmem>>, vector<1x1x256xf32>,
    %c0_16 = arith.constant 0 : index
    %c0_17 = arith.constant 0 : index
    %c0_18 = arith.constant 0 : index
    %29 = vector.load %arg5[%c0_16, %c0_17, %c0_18] : memref<1x1x256xf32, #tpu.memory_space<vmem>>, vector<1x1x256xf32>
    %30 = arith.extui %21 : vector<1x1x256xi1> to vector<1x1x256xi32>
    %31 = arith.sitofp %30 : vector<1x1x256xi32> to vector<1x1x256xf32>
    %32 = arith.addf %29, %31 : vector<1x1x256xf32>
    %c0_19 = arith.constant 0 : index
    %c0_20 = arith.constant 0 : index
    %c0_21 = arith.constant 0 : index
    %33 = vector.load %arg5[%c0_19, %c0_20, %c0_21] : memref<1x1x256xf32, #tpu.memory_space<vmem>>, vector<1x1x256xf32>
    tpu.vector_store %arg5[%c0_19, %c0_20, %c0_21], %32 {strides = array<i32>} : memref<1x1x256xf32, #tpu.memory_space<vmem>>, vector<1x1x256xf32>,
    return
  }
  func.func @transform_0(%arg0: i32, %arg1: i32) -> (i32, i32, i32) {
    %c0_i32 = arith.constant 0 : i32
    %c0_i32_0 = arith.constant 0 : i32
    return %arg0, %c0_i32, %arg1 : i32, i32, i32
  }
  func.func @transform_1(%arg0: i32, %arg1: i32) -> (i32, i32, i32) {
    %c0_i32 = arith.constant 0 : i32
    %c0_i32_0 = arith.constant 0 : i32
    return %arg0, %c0_i32, %arg1 : i32, i32, i32
  }
  func.func @transform_2(%arg0: i32, %arg1: i32) -> (i32, i32, i32) {
    %c0_i32 = arith.constant 0 : i32
    %c0_i32_0 = arith.constant 0 : i32
    %c0_i32_1 = arith.constant 0 : i32
    return %arg0, %c0_i32, %c0_i32_0 : i32, i32, i32
  }
  func.func @transform_3(%arg0: i32, %arg1: i32) -> (i32, i32, i32) {
    %c0_i32 = arith.constant 0 : i32
    %c0_i32_0 = arith.constant 0 : i32
    %c0_i32_1 = arith.constant 0 : i32
    return %arg0, %c0_i32, %c0_i32_0 : i32, i32, i32
  }
}

</mosaic_0001>

<bundles_post_ra>
// kernel: tpu_custom_call.1
= control target key start
LH: loop header
LB: loop body
LE: loop exit
PB: predicated region body
PF: predicated region fallthrough
CT: control target
= control target key end

     0   :  { %9 = vsyncpa [#allocation3], 0  ;;  %s1058_s0 = inlined_call_operand.hbm [shape: f32[2,4,256], index: 0, kind: input, shape index: {}]   ;;  %s1059_s1 = inlined_call_operand.hbm [shape: s32[2,1,256], index: 1, kind: input, shape index: {}]   ;;  %s1060_s2 = inlined_call_operand.hbm [shape: f32[2,1,256], index: 2, kind: output, shape index: {0}]   ;;  %s1061_s3 = inlined_call_operand.hbm [shape: f32[2,1,256], index: 3, kind: output, shape index: {1}]  }
   0x1   :  { %11 = vsyncpa [#allocation3 + $0x1], 0 }
   0x2   :  { %12 = vsyncpa [#allocation6], 0 }
   0x3   :  { %14 = vsyncpa [#allocation6 + $0x1], 0 }
   0x4   :  { %15 = vsyncpa [#allocation4], 0 }
   0x5   :  { %17 = vsyncpa [#allocation4 + $0x1], 0 }
   0x6   :  { %18 = vsyncpa [#allocation9], 0 }
   0x7   :  { %20 = vsyncpa [#allocation9 + $0x1], 0  ;;  %s853_s12 = smov 0   ;;  %s855_s13 = smov 0  }
   0x8   :  { %s857_s14 = smov 0   ;;  %s859_s15 = smov 0  }
   0x9   :  { %s861_s16 = smov 0   ;;  %s863_s17 = smov 0  }
   0xa LB: > { %s551_s18 = sadd.s32 4294967295, %s830_s17   ;;  %s552_s19 = sadd.s32 4294967294, %s830_s17   ;;  %s830_s17 = sphi %s863_s17, %s26_s17   ;;  %s826_s16 = sphi %s861_s16, %s1073_s16   ;;  %s822_s15 = sphi %s859_s15, %s1072_s15   ;;  %s818_s14 = sphi %s857_s14, %s1071_s14   ;;  %s814_s13 = sphi %s855_s13, %s1070_s13   ;;  %s810_s12 = sphi %s853_s12, %s1069_s12  }
   0xb   : > { %s38_s20 = sadd.s32 1, %s826_s16  ;;  %s47_s21 = sadd.s32 1, %s818_s14 }
   0xc   : > { %p40_p0 = scmp.ge.s32.totalorder %s38_s20, 2  ;;  %p54_p1 = scmp.ne.s32.totalorder %s818_s14, %s814_s13 }
   0xd   : > { %p55_p2 = scmp.eq.s32.totalorder %s830_s17, 0  ;;  %p60_p3 = scmp.ne.s32.totalorder %s814_s13, %s810_s12 }
   0xe   : > { %s1075_s20 = smov (%p40_p0, %s38_s20), 0  ;;  %p61_p5 = scmp.eq.s32.totalorder %s551_s18, 0 }
   0xf   : > { %p894_p4 = por %p55_p2, %p54_p1  ;;  %s42_s23 = ssub.s32 %s826_s16, %s1075_s20 }
  0x10   : > { %p112_p6 = scmp.eq.s32.totalorder %s551_s18, 1  ;;  %p45_p7 = scmp.eq.s32.totalorder %s42_s23, 0 }
  0x11   : > { %p900_p8 = por %p61_p5, %p60_p3  ;;  %p118_p10 = scmp.eq.s32.totalorder %s552_s19, 1 }
  0x12   : > { %p904_p9 = por %p112_p6, %p54_p1  ;;  %p554_p12 = scmp.ge.s32.totalorder %s830_s17, 2 }
  0x13   : > { %s909_s26 = scalar_select %p45_p7, %s818_s14, %s47_s21  }
  0x14   : > { %p911_p11 = por %p118_p10, %p60_p3  ;;  %p595_p13 = scmp.lt.s32.totalorder %s830_s17, 2 }
  0x15   : > { %s164_s28 = sand.u32 1, %s818_s14   ;;  %s572_s30 = sshll.u32 %s826_s16, 3 }
  0x16   : > { %s555_s29 = sshll.u32 %s164_s28, 3  ;;  %s175_s6 = scalar_lea.hbm %s1058_s0, %s572_s30 }
  0x17   : > { %s168_s7 = scalar_lea.vmem [#allocation2], %s555_s29  ;;  %s177_s9 = sshll.u32 %s175_s6, 4  ;;  %s178_s9 = int_to_ptr.hbm [resolvable:$true] %s177_s9 }
  0x18   : > { %s179_s8 = sshll.u32 %s168_s7, 4  ;;  %p924_p0 = pnand %p595_p13, %p894_p4  ;;  %s180_s8 = int_to_ptr.vmem [resolvable:$true] %s179_s8 }
  0x19   : > { %p560_p1 = scmp.ge.s32.totalorder %s830_s17, 1  ;;  %p205_p2 = scmp.lt.s32.totalorder %s830_s17, 3 }
  0x1a   : > { %s165_s11 = scalar_lea.sflag [#allocation3], %s164_s28  ;;  %s558_s18 = sshll.u32 %s164_s28, 1 }
  0x1b   : > { %584 = dma.hbm_to_vmem [thread:$0]  (!%p924_p0), %s178_s9, 128, %s180_s8, %s165_s11  }
  0x1c   : > { %p206_p3 = pnand %p560_p1, %p205_p2  ;;  %s559_s19 = sshll.u32 %s826_s16, 1 }
  0x1d   : > { %s196_s29 = scalar_lea.hbm %s1059_s1, %s559_s19  ;;  %s190_s30 = scalar_lea.vmem [#allocation5], %s558_s18 }
  0x1e   : > { %s200_s22 = sshll.u32 %s190_s30, 4  ;;  %s198_s4 = sshll.u32 %s196_s29, 4  ;;  %s201_s22 = int_to_ptr.vmem [resolvable:$true] %s200_s22  ;;  %s199_s4 = int_to_ptr.hbm [resolvable:$true] %s198_s4 }
  0x1f   : > { %s187_s5 = scalar_lea.sflag [#allocation6], %s164_s28  ;;  %209 = sbr.rel (%p206_p3) target bundleno = 120 (0x78), region = 28 }
  0x20   : > { %587 = dma.hbm_to_vmem [thread:$0]  (!%p924_p0), %s199_s4, 32, %s201_s22, %s187_s5  }
  0x21   : > { %s939_s6 = sand.u32 (!%p206_p3), 1, %s814_s13  }
  0x22   : > { %s561_s7 = sshll.u32 (!%p206_p3), %s939_s6, 3  ;;  %s212_s8 = scalar_lea.sflag (!%p206_p3), [#allocation3], %s939_s6 }
  0x23   : > { %s215_s9 = scalar_lea.vmem (!%p206_p3), [#allocation2], %s561_s7 }
  0x24   : > { %793 = dma.done.wait (%p900_p8), %s212_s8, 128  }
  0x25   : > { %795 = vsyncadd (%p900_p8), %s212_s8, 4294967168  ;;  %s948_s28 = sshll.u32 %s939_s6, 1  ;;  %s222_s10 = scalar_lea.sflag [#allocation6], %s939_s6 }
  0x26   : > { %s225_s11 = scalar_lea.vmem [#allocation5], %s948_s28 }
  0x27   : > { %797 = dma.done.wait (%p900_p8), %s222_s10, 32  }
  0x28   : > { %799 = vsyncadd (%p900_p8), %s222_s10, 4294967264  ;;  %v271_v0 = vld [vmem:[%s215_s9] sm:$0xff]  ;;  %vm279_vm0 = vcmask 1043456   ;;  %v265_v19 = vlaneseq  ;;  %s970_s24 = scalar_lea.vmem [#allocation7], %s948_s28  ;;  %v832_v23 = vmov 0.0   ;;  %s258_s18 = scalar_lea.vmem [#allocation8], %s948_s28 }
  0x29   : > { %274 = vst [vmem:[#allocation1] ss:$2 sm:$0xff] %v271_v0  ;;  %s568_s19 = sshll.u32 %s822_s15, 1  ;;  %v986_v25 = vld [vmem:[%s225_s11] sm:$0x3]  ;;  %s409_s30 = sshll.u32 %s258_s18, 4  ;;  %s410_s30 = int_to_ptr.vmem [resolvable:$true] %s409_s30 }
  0x2a   : > { %vm965_vm1 = vcmp.lt.s32.totalorder %v265_v19, 256  ;;  %s407_s29 = scalar_lea.hbm %s1061_s3, %s568_s19  ;;  %vm353_vm2 = vcmp.ne.s32.totalorder %v986_v25, 4294967295  ;;  %v327_v33 = vshrl.u32 %v265_v19, 7  ;;  %v328_v36 = vperm.slane %v986_v25, 0  ;;  %s383_s4 = scalar_lea.sflag [#allocation9], %s939_s6 }
  0x2b   : > { %269 = vst.msk [vmem:[%s970_s24] sm:$0x3] %vm965_vm1, %v832_v23  ;;  %s411_s22 = sshll.u32 %s407_s29, 4  ;;  %v565_v26 = vsel %vm353_vm2, 1.0, %v832_v23  ;;  %v329_v37 = vperm.slane %v986_v25, 1  ;;  %s732_s28 = scalar_lea.hbm %s1061_s3, 4  ;;  %s412_s22 = int_to_ptr.hbm [resolvable:$true] %s411_s22 }
  0x2c   : > { %270 = vst.msk [vmem:[%s258_s18] sm:$0x3] %vm965_vm1, %v832_v23  ;;  %s726_s5 = sshra.s32 %s412_s22, 4  ;;  %s727_s5 = int_to_ptr.hbm [resolvable:$true] %s726_s5 }
  0x2d   : > { %s728_s7 = scalar_lea.hbm %s727_s5, 2  ;;  %p733_p7 = scmp.lt.s32.totalorder %s727_s5, %s1061_s3 }
  0x2e   : > { %p729_p4 = scmp.ne.s32.totalorder %s727_s5, %s728_s7  ;;  %p734_p8 = scmp.lt.s32.totalorder %s732_s28, %s728_s7 }
  0x30   : > { %v275_v1 = vld.sshfl [vmem:[#allocation1] sm:$0xff pattern:$0x75316420]  ;;  %v276_v2 = vld.sshfl [vmem:[#allocation1 + $0x8] sm:$0xff pattern:$0x75316420]  ;;  %p730_p5 = pnand %p729_p4, %p904_p9  ;;  %p735_p10 = por %p734_p8, %p733_p7 }
  0x31   : > { %v280_v3 = vsel %vm279_vm0, %v275_v1, -inf  ;;  %v287_v4 = vsel %vm279_vm0, %v276_v2, -inf }
  0x32   : > { %v281_v5 = vrot.slane %v280_v3, 4  ;;  %v288_v6 = vrot.slane %v287_v4, 4  ;;  %p731_p6 = pneg %p730_p5 }
  0x33   : > { %v372_v27 = vld [vmem:[%s258_s18] sm:$0x3] }
  0x34   : > { %v282_v7 = vmax.f32 %v280_v3, %v281_v5  ;;  %v289_v8 = vmax.f32 %v287_v4, %v288_v6  ;;  %v375_v30 = vadd.f32 %v565_v26, %v372_v27  ;;  %p736_p13 = pnand %p735_p10, %p731_p6 }
  0x36   : > { %v283_v9 = vrot.slane %v282_v7, 2  ;;  %v290_v10 = vrot.slane %v289_v8, 2  ;;  %376 = vst.msk [vmem:[%s258_s18] sm:$0x3] %vm965_vm1, %v375_v30 }
  0x38   : > { %v284_v11 = vmax.f32 %v282_v7, %v283_v9  ;;  %v291_v12 = vmax.f32 %v289_v8, %v290_v10 }
  0x3a   : > { %v285_v13 = vrot.slane %v284_v11, 1  ;;  %v292_v14 = vrot.slane %v291_v12, 1 }
  0x3c   : > { %v958_v15 = vmax.f32 %v291_v12, %v292_v14  ;;  %v960_v16 = vmax.f32 %v284_v11, %v285_v13 }
  0x3e   : > { %v296_v17 = vrot.slane %v958_v15, 4 }
  0x40   : > { %v297_v18 = vsel %vm279_vm0, %v960_v16, %v296_v17 }
  0x41   : > { %v299_v20 = vsub.f32 %v271_v0, %v297_v18 }
  0x43   : > { %v300_v22 = vmul.f32 1.442695, %v299_v20 }
  0x45   : > { %646 = vpow2.f32 %v300_v22 }
  0x4b   : > { %v647_v24 = vpop.eup %646 }
  0x4c   : > { %303 = vst [vmem:[#allocation1] ss:$2 sm:$0xff] %v647_v24 }
  0x53   : > { %v304_v28 = vld.sshfl [vmem:[#allocation1] sm:$0xff pattern:$0x75316420]  ;;  %v305_v29 = vld.sshfl [vmem:[#allocation1 + $0x8] sm:$0xff pattern:$0x75316420] }
  0x54   : > { %v308_v31 = vsel %vm279_vm0, %v304_v28, 0.0  ;;  %v315_v32 = vsel %vm279_vm0, %v305_v29, 0.0  ;;  %332 = vst [vmem:[#allocation1] ss:$2 sm:$0xff] %v271_v0 }
  0x55   : > { %v309_v34 = vrot.slane %v308_v31, 4  ;;  %v316_v35 = vrot.slane %v315_v32, 4 }
  0x56   : > { %739 = shalt.err (!%p736_p13)
}
  0x57   : > { %578 = dma.vmem_to_hbm [thread:$0]  (%p904_p9), %s410_s30, 32, %s412_s22, %s383_s4   ;;  %v310_v38 = vadd.f32 %v309_v34, %v308_v31  ;;  %v317_v39 = vadd.f32 %v316_v35, %v315_v32  ;;  %vm330_vm3 = vcmp.eq.s32.totalorder %v327_v33, %v328_v36  ;;  %vm331_vm4 = vcmp.eq.s32.totalorder %v327_v33, %v329_v37  ;;  %v354_v11 = vld [vmem:[%s970_s24] sm:$0x3] }
  0x58   : > { %s393_s23 = scalar_lea.hbm %s1060_s2, %s568_s19  ;;  %vm362_vm5 = vcmask 1040384   ;;  %s395_s29 = sshll.u32 %s970_s24, 4  ;;  %s396_s29 = int_to_ptr.vmem [resolvable:$true] %s395_s29 }
  0x59   : > { %v311_v40 = vrot.slane %v310_v38, 2  ;;  %v318_v41 = vrot.slane %v317_v39, 2  ;;  %s397_s30 = sshll.u32 %s393_s23, 4  ;;  %s378_s15 = scalar_lea.sflag [#allocation4], %s939_s6  ;;  %s398_s30 = int_to_ptr.hbm [resolvable:$true] %s397_s30 }
  0x5a   : > { %s754_s22 = sshra.s32 %s398_s30, 4  ;;  %s760_s7 = scalar_lea.hbm %s1060_s2, 4  ;;  %s755_s22 = int_to_ptr.hbm [resolvable:$true] %s754_s22 }
  0x5b   : > { %v312_v42 = vadd.f32 %v311_v40, %v310_v38  ;;  %v319_v43 = vadd.f32 %v318_v41, %v317_v39  ;;  %v333_v44 = vld.sshfl [vmem:[#allocation1] sm:$0xff pattern:$0x75316420]  ;;  %v334_v45 = vld.sshfl [vmem:[#allocation1 + $0x8] sm:$0xff pattern:$0x75316420]  ;;  %p761_p3 = scmp.lt.s32.totalorder %s755_s22, %s1060_s2 }
  0x5c   : > { %v337_v46 = vsel %vm330_vm3, %v333_v44, 0.0  ;;  %v338_v47 = vsel %vm331_vm4, %v334_v45, 0.0  ;;  %s756_s19 = scalar_lea.hbm %s755_s22, 2 }
  0x5d   : > { %v313_v48 = vrot.slane %v312_v42, 1  ;;  %v320_v49 = vrot.slane %v319_v43, 1  ;;  %v339_v50 = vsel %vm279_vm0, %v337_v46, 0.0  ;;  %v346_v51 = vsel %vm279_vm0, %v338_v47, 0.0  ;;  %p757_p0 = scmp.ne.s32.totalorder %s755_s22, %s756_s19  ;;  %p762_p4 = scmp.lt.s32.totalorder %s760_s7, %s756_s19 }
  0x5e   : > { %v340_v52 = vrot.slane %v339_v50, 4  ;;  %v347_v53 = vrot.slane %v346_v51, 4 }
  0x5f   : > { %v314_v54 = vadd.f32 %v313_v48, %v312_v42  ;;  %v321_v55 = vadd.f32 %v320_v49, %v319_v43  ;;  %p758_p1 = pnand %p757_p0, %p904_p9  ;;  %p763_p5 = por %p762_p4, %p761_p3 }
  0x60   : > { %v341_v56 = vadd.f32 %v340_v52, %v339_v50  ;;  %v348_v57 = vadd.f32 %v347_v53, %v346_v51 }
  0x61   : > { %648 = vlog2.f32 %v314_v54  ;;  %p759_p2 = pneg %p758_p1 }
  0x62   : > { %650 = vlog2.f32 %v321_v55  ;;  %v342_v58 = vrot.slane %v341_v56, 2  ;;  %v349_v59 = vrot.slane %v348_v57, 2 }
  0x63   : > { %p764_p6 = pnand %p763_p5, %p759_p2 }
  0x64   : > { %v350_v60 = vadd.f32 %v349_v59, %v348_v57  ;;  %v343_v61 = vadd.f32 %v342_v58, %v341_v56 }
  0x66   : > { %v351_v63 = vrot.slane %v350_v60, 1  ;;  %v344_v3 = vrot.slane %v343_v61, 1 }
  0x67   : > { %v649_v62 = vpop.eup %648 }
  0x68   : > { %v651_v0 = vpop.eup %650  ;;  %v323_v1 = vmul.f32 0.6931472, %v649_v62  ;;  %v352_v4 = vadd.f32 %v351_v63, %v350_v60  ;;  %v345_v7 = vadd.f32 %v344_v3, %v343_v61 }
  0x69   : > { %v325_v2 = vmul.f32 0.6931472, %v651_v0 }
  0x6a   : > { %v355_v5 = vadd.f32 %v323_v1, %v960_v16 }
  0x6b   : > { %v356_v6 = vadd.f32 %v325_v2, %v958_v15 }
  0x6c   : > { %v357_v9 = vsub.f32 %v355_v5, %v345_v7 }
  0x6d   : > { %v358_v8 = vsub.f32 %v356_v6, %v352_v4 }
  0x6f   : > { %v361_v10 = vrot.slane %v358_v8, 7 }
  0x71   : > { %v363_v12 = vsel %vm362_vm5, %v357_v9, %v361_v10 }
  0x72   : > { %v365_v13 = vsel %vm353_vm2, %v363_v12, 0.0 }
  0x73   : > { %v366_v14 = vadd.f32 %v365_v13, %v354_v11 }
  0x75   : > { %371 = vst.msk [vmem:[%s970_s24] sm:$0x3] %vm965_vm1, %v366_v14 }
  0x76   : > { %767 = shalt.err (!%p764_p6)
}
  0x77   : > { %577 = dma.vmem_to_hbm [thread:$0]  (%p904_p9), %s396_s29, 32, %s398_s30, %s378_s15  }
  0x78 PF: > { %s423_s6 = sand.u32 1, %s810_s12   ;;  %p589_p7 = pnand %p554_p12, %p911_p11 }
  0x79   : > { %s424_s24 = scalar_lea.sflag [#allocation4], %s423_s6 }
  0x7a   : > { %p590_p8 = pneg %p589_p7 }
  0x7c   : > { %801 = dma.done.wait (%p590_p8), %s424_s24, 32  }
  0x7d   : > { %803 = vsyncadd (%p590_p8), %s424_s24, 4294967264  ;;  %s434_s28 = scalar_lea.sflag [#allocation9], %s423_s6 }
  0x7e   : > { %805 = dma.done.wait (%p590_p8), %s434_s28, 32  }
  0x7f   : > { %807 = vsyncadd (%p590_p8), %s434_s28, 4294967264  ;;  %s26_s17 = sadd.s32 1, %s830_s17   ;;  %s1069_s12 = smov %s814_s13 }
  0x80   : > { %p23_p10 = scmp.ge.s32.totalorder %s26_s17, 4   ;;  %s1070_s13 = smov %s818_s14 }
  0x81   : > { %s1071_s14 = smov %s909_s26  ;;  %s1072_s15 = smov %s826_s16 }
  0x82   : > { %s1073_s16 = smov %s1075_s20  ;;  %25 = sbr.rel (!%p23_p10) target bundleno = 10 (0xa), region = 107 }
  0x87   :  { %440 = vsyncpa [#allocation3], 1 }
  0x88   :  { %442 = vsyncpa [#allocation3 + $0x1], 1 }
  0x89   :  { %443 = vsyncpa [#allocation6], 1 }
  0x8a   :  { %445 = vsyncpa [#allocation6 + $0x1], 1 }
  0x8b   :  { %446 = vsyncpa [#allocation4], 1 }
  0x8c   :  { %448 = vsyncpa [#allocation4 + $0x1], 1 }
  0x8d   :  { %449 = vsyncpa [#allocation9], 1 }
  0x8e   :  { %451 = vsyncpa [#allocation9 + $0x1], 1 }

</bundles_post_ra>
